<compile_context>
chip_gen: v7x
topology: tpu7x:2x2x1
jax: 0.10.0
libtpu: 0.0.40
codegen_flags: <defaults>
</compile_context>

<pallas_src>
import numpy as np
import jax
import jax.numpy as jnp
from jax.experimental import pallas as pl
from jax.experimental.pallas import tpu as pltpu


def _round_up(v, m):
    return (v + m - 1) // m * m


def geq_constant_kernel(x_ref, keep_ref, const_ref, o_ref):
    # x_ref:     (tb, td) input tile streaming through VMEM.
    # keep_ref:  (1, td)  per-feature pass-through mask (1 -> keep x, 0 -> replace).
    # const_ref: (1, td)  per-feature replacement constant (1.0 for ixs1, 0.0 for ixs_neg).
    # One compare + one select; (1, td) operands broadcast along sublanes.
    o_ref[...] = jnp.where(keep_ref[...] != 0, x_ref[...], const_ref[...])


# The per-feature mask/const vectors are pure functions of the index-set
# configuration; build them once and cache the device arrays (no per-call
# host-side numpy work or H2D transfer on the dispatch path).
_CODE_CACHE = {}


def _keep_const(ixs1, ixs_neg, ixs_not, d_padded, dtype):
    key = (tuple(map(int, ixs1)), tuple(map(int, ixs_neg)),
           tuple(map(int, ixs_not)), int(d_padded), jnp.dtype(dtype).name)
    hit = _CODE_CACHE.get(key)
    if hit is not None:
        return hit
    keep_np = np.zeros((1, d_padded), dtype=np.float32)
    const_np = np.zeros((1, d_padded), dtype=np.float32)
    if len(ixs_not):
        keep_np[0, np.asarray(ixs_not, dtype=np.int64)] = 1.0
    if len(ixs1):
        const_np[0, np.asarray(ixs1, dtype=np.int64)] = 1.0
    # ixs_neg columns (and any lane-padding columns): keep=0, const=0 -> 0.0
    keep = jnp.asarray(keep_np, dtype=dtype)
    const = jnp.asarray(const_np, dtype=dtype)
    _CODE_CACHE[key] = (keep, const)
    return keep, const


def _pick_tiles(B, D, dtype, target_tile_bytes, max_tile_d):
    itemsize = jnp.dtype(dtype).itemsize
    # dtype-aware sublane packing: 8 rows for 32-bit, 16 for bf16, 32 for int8/fp8
    sub = {4: 8, 2: 16, 1: 32}.get(itemsize, 8)
    d128 = _round_up(D, 128)
    # largest multiple of 128 (<= max_tile_d) that divides d128 -> no dead
    # feature tiles; 128 always divides d128 so the loop terminates.
    td = min(_round_up(max_tile_d, 128), d128)
    while td > 128 and d128 % td != 0:
        td -= 128
    # batch tile: ~target_tile_bytes per block, multiple of the sublane pack.
    tb = target_tile_bytes // (td * itemsize)
    tb = max(sub, (tb // sub) * sub)
    tb = min(tb, _round_up(B, sub))
    return tb, td, d128, itemsize


def geq_constant(x, ixs1, ixs_neg, ixs_not, *,
                 target_tile_bytes=2 << 20, max_tile_d=2048):
    """Pallas implementation of GEQConstant.forward for x of shape (B, D)."""
    B, D = x.shape
    dtype = x.dtype

    tb, td, d128, itemsize = _pick_tiles(B, D, dtype, target_tile_bytes, max_tile_d)
    keep, const = _keep_const(ixs1, ixs_neg, ixs_not, d128, dtype)

    grid_b = pl.cdiv(B, tb)
    grid_f = d128 // td   # == pl.cdiv(D, td) since td | d128 and td % 128 == 0

    # Outermost grid axis = axis with more tiles (balanced split across v7x's
    # two TensorCores).  Ties go to the feature axis so the tiny keep/const
    # blocks keep a constant block index across the inner batch sweep.
    if grid_f >= grid_b:
        grid = (grid_f, grid_b)
        xmap = lambda f, b: (b, f)
        kmap = lambda f, b: (0, f)
    else:
        grid = (grid_b, grid_f)
        xmap = lambda b, f: (b, f)
        kmap = lambda b, f: (0, f)

    # No host-side pad or slice: out_shape is exactly (B, D); partial tail
    # blocks (ragged B or D) get bounded input DMAs and masked output writes.
    return pl.pallas_call(
        geq_constant_kernel,
        out_shape=jax.ShapeDtypeStruct((B, D), dtype),
        grid=grid,
        in_specs=[
            pl.BlockSpec((tb, td), xmap),
            pl.BlockSpec((1, td), kmap),
            pl.BlockSpec((1, td), kmap),
        ],
        out_specs=pl.BlockSpec((tb, td), xmap),
        compiler_params=pltpu.CompilerParams(
            dimension_semantics=("parallel", "parallel")),
        cost_estimate=pl.CostEstimate(
            flops=B * D,
            transcendentals=0,
            bytes_accessed=2 * B * D * itemsize + 2 * d128 * itemsize),
    )(x, keep, const)


def geq_constant_reference(x, ixs1, ixs_neg, ixs_not):
    """Pure-JAX port of the PyTorch forward (cat + argsort permutation)."""
    forward_transform = list(ixs1) + list(ixs_neg) + list(ixs_not)
    reverse_transform = np.argsort(np.asarray(forward_transform))
    split1 = x[:, np.asarray(ixs1)]
    split2 = x[:, np.asarray(ixs_neg)]
    split3 = x[:, np.asarray(ixs_not)]
    cat = jnp.concatenate(
        (jnp.ones_like(split1), jnp.zeros_like(split2), split3), axis=1)
    return cat[:, reverse_transform]


def _split_ixs(D, seed):
    perm = np.random.default_rng(seed).permutation(D)
    third = D // 3
    return (perm[:third].tolist(),
            perm[third:2 * third].tolist(),
            perm[2 * third:].tolist())


if __name__ == "__main__":
    key = jax.random.PRNGKey(0)
    k1, k2, k3 = jax.random.split(key, 3)

    # Case 1: small aligned-ish shape (B=8, D=32) -> single-tile grid,
    # feature axis lane-padded to 128 only inside the kernel (no host pad).
    B, D = 8, 32
    ixs1, ixs_neg, ixs_not = _split_ixs(D, 0)
    x = jax.random.normal(k1, (B, D), dtype=jnp.float32)
    out = jax.block_until_ready(geq_constant(x, ixs1, ixs_neg, ixs_not))
    ref = geq_constant_reference(x, ixs1, ixs_neg, ixs_not)
    np.testing.assert_allclose(np.asarray(out), np.asarray(ref), rtol=0, atol=0)

    # Case 2: ragged shape (B=40, D=300) with tiny tiles -> multi-tile grid
    # (3 feature x 2 batch) exercising masked tail blocks on both axes,
    # with no host-side pad or slice.
    B2, D2 = 40, 300
    ixs1_2, ixs_neg_2, ixs_not_2 = _split_ixs(D2, 1)
    x2 = jax.random.normal(k2, (B2, D2), dtype=jnp.float32)
    out2 = jax.block_until_ready(
        geq_constant(x2, ixs1_2, ixs_neg_2, ixs_not_2,
                     target_tile_bytes=16 * 1024, max_tile_d=128))
    ref2 = geq_constant_reference(x2, ixs1_2, ixs_neg_2, ixs_not_2)
    np.testing.assert_allclose(np.asarray(out2), np.asarray(ref2), rtol=0, atol=0)

    # Case 3: bf16 input -> dtype-aware sublane rounding (16-row pack),
    # exact pass-through / 0 / 1 values so equality is still bitwise.
    B3, D3 = 24, 256
    ixs1_3, ixs_neg_3, ixs_not_3 = _split_ixs(D3, 2)
    x3 = jax.random.normal(k3, (B3, D3), dtype=jnp.bfloat16)
    out3 = jax.block_until_ready(geq_constant(x3, ixs1_3, ixs_neg_3, ixs_not_3))
    ref3 = geq_constant_reference(x3, ixs1_3, ixs_neg_3, ixs_not_3)
    np.testing.assert_array_equal(np.asarray(out3), np.asarray(ref3))

    # TODO(synk): threshold_upper/lower/limit and threshold1p() are training-time
    # state mutation only; they do not appear in forward() and are not kernelized.

    print("KERNEL_OK")
</pallas_src>

<mosaic_0001>
module attributes {stable_mosaic.version = 11 : i64} {
  func.func @geq_constant_kernel(%arg0: i32, %arg1: i32, %arg2: memref<8x128xf32, #tpu.memory_space<vmem>>, %arg3: memref<1x128xf32, #tpu.memory_space<vmem>>, %arg4: memref<1x128xf32, #tpu.memory_space<vmem>>, %arg5: memref<8x128xf32, #tpu.memory_space<vmem>>) attributes {dimension_semantics = [#tpu.dimension_semantics<parallel>, #tpu.dimension_semantics<parallel>], iteration_bounds = array<i64: 1, 1>, scalar_prefetch = 0 : i64, scratch_operands = 0 : i64, tpu.core_type = #tpu.core_type<tc>, window_params = [{transform_indices = @transform_0, window_bounds = array<i64: 8, 128>}, {transform_indices = @transform_1, window_bounds = array<i64: 1, 128>}, {transform_indices = @transform_2, window_bounds = array<i64: 1, 128>}, {transform_indices = @transform_3, window_bounds = array<i64: 8, 128>}]} {
    %c0 = arith.constant 0 : index
    %c0_0 = arith.constant 0 : index
    %0 = vector.load %arg3[%c0, %c0_0] : memref<1x128xf32, #tpu.memory_space<vmem>>, vector<1x128xf32>
    %cst = arith.constant 0.000000e+00 : f32
    %1 = vector.broadcast %cst : f32 to vector<1x128xf32>
    %2 = arith.cmpf one, %0, %1 : vector<1x128xf32>
    %c0_1 = arith.constant 0 : index
    %c0_2 = arith.constant 0 : index
    %3 = vector.load %arg2[%c0_1, %c0_2] : memref<8x128xf32, #tpu.memory_space<vmem>>, vector<8x128xf32>
    %c0_3 = arith.constant 0 : index
    %c0_4 = arith.constant 0 : index
    %4 = vector.load %arg4[%c0_3, %c0_4] : memref<1x128xf32, #tpu.memory_space<vmem>>, vector<1x128xf32>
    %5 = vector.shape_cast %2 : vector<1x128xi1> to vector<1x128xi1>
    %6 = vector.broadcast %5 : vector<1x128xi1> to vector<8x128xi1>
    %7 = vector.shape_cast %4 : vector<1x128xf32> to vector<1x128xf32>
    %8 = vector.broadcast %7 : vector<1x128xf32> to vector<8x128xf32>
    %9 = arith.select %6, %3, %8 : vector<8x128xi1>, vector<8x128xf32>
    %c0_5 = arith.constant 0 : index
    %c0_6 = arith.constant 0 : index
    %10 = vector.load %arg5[%c0_5, %c0_6] : memref<8x128xf32, #tpu.memory_space<vmem>>, vector<8x128xf32>
    tpu.vector_store %arg5[%c0_5, %c0_6], %9 {strides = array<i32>} : memref<8x128xf32, #tpu.memory_space<vmem>>, vector<8x128xf32>,
    return
  }
  func.func @transform_0(%arg0: i32, %arg1: i32) -> (i32, i32) {
    %c0_i32 = arith.constant 0 : i32
    return %arg1, %arg0 : i32, i32
  }
  func.func @transform_1(%arg0: i32, %arg1: i32) -> (i32, i32) {
    %c0_i32 = arith.constant 0 : i32
    %c0_i32_0 = arith.constant 0 : i32
    return %c0_i32, %arg0 : i32, i32
  }
  func.func @transform_2(%arg0: i32, %arg1: i32) -> (i32, i32) {
    %c0_i32 = arith.constant 0 : i32
    %c0_i32_0 = arith.constant 0 : i32
    return %c0_i32, %arg0 : i32, i32
  }
  func.func @transform_3(%arg0: i32, %arg1: i32) -> (i32, i32) {
    %c0_i32 = arith.constant 0 : i32
    return %arg1, %arg0 : i32, i32
  }
}

</mosaic_0001>

<bundles_post_ra>
// kernel: tpu_custom_call.1
= control target key start
LH: loop header
LB: loop body
LE: loop exit
PB: predicated region body
PF: predicated region fallthrough
CT: control target
= control target key end

     0   :  { %8 = vsyncpa [#allocation3], 0  ;;  %s165_s0 = inlined_call_operand.hbm [shape: f32[8,32], index: 0, kind: input, shape index: {}]   ;;  %s166_s1 = inlined_call_operand.vmem [shape: f32[1,128], index: 1, kind: input, shape index: {}]   ;;  %s167_s2 = inlined_call_operand.vmem [shape: f32[1,128], index: 2, kind: input, shape index: {}]   ;;  %s168_s3 = inlined_call_operand.hbm [shape: f32[8,32], index: 3, kind: output, shape index: {}]  }
   0x1   :  { %9 = vsyncpa [#allocation4], 0  ;;  %s112_s12 = smov [#allocation2]   ;;  %s64_s16 = scalar_lea.hbm %s165_s0, 128 }
   0x2   :  { %s16_s13 = sshll.u32 %s112_s12, 4  ;;  %p65_p0 = scmp.ne.s32.totalorder %s165_s0, %s64_s16  ;;  %s17_s13 = int_to_ptr.vmem [resolvable:$true] %s16_s13 }
   0x3   :  { %p68_p1 = scmp.lt.u32.totalorder %s64_s16, %s165_s0 }
   0x5   :  { %p70_p2 = pnand %p68_p1, %p65_p0 }
   0x7   :  { %73 = shalt.err (!%p70_p2)
}
   0x8   :  { %s74_s21 = scalar_lea.vmem %s17_s13, 128  ;;  %p79_p4 = scmp.lt.s32.totalorder %s17_s13, %s17_s13 }
   0x9   :  { %p75_p3 = scmp.ne.s32.totalorder %s17_s13, %s74_s21  ;;  %p80_p5 = scmp.lt.s32.totalorder %s74_s21, %s74_s21 }
   0xb   :  { %p81_p6 = por %p80_p5, %p79_p4 }
   0xd   :  { %p82_p7 = pnand %p81_p6, %p75_p3 }
   0xf   :  { %85 = shalt.err (!%p82_p7)
}
  0x10   :  { %19 = dma.hbm_to_vmem [thread:$0]  %s165_s0, 128, %s17_s13, [#allocation3]  }
  0x11   :  { %108 = dma.done.wait [#allocation3], 128  }
  0x12   :  { %109 = vsyncadd [#allocation3], 4294967168  ;;  %v32_v0 = vlaneseq  ;;  %v27_v3 = vld [vmem:[%s166_s1] sm:$0x1]  ;;  %v113_v4 = vmov 0   ;;  %s114_s26 = smov [#allocation5]  }
  0x13   :  { %vm28_vm0 = vcmp.ne.f32.partialorder %v27_v3, 0.0  ;;  %s51_s27 = sshll.u32 %s114_s26, 4  ;;  %v29_v6 = vld [vmem:[#allocation2] sm:$0xff]  ;;  %s52_s27 = int_to_ptr.vmem [resolvable:$true] %s51_s27 }
  0x14   :  { %v33_v1 = vshrl.u32 %v32_v0, 7  ;;  %v31_v5 = vsel %vm28_vm0, 1, %v113_v4  ;;  %v60_v7 = vld [vmem:[%s167_s2] ss:$0 sm:$0xff]  ;;  %s86_s0 = scalar_lea.vmem %s52_s27, 128  ;;  %p91_p9 = scmp.lt.s32.totalorder %s52_s27, %s52_s27 }
  0x15   :  { %p87_p8 = scmp.ne.s32.totalorder %s52_s27, %s86_s0  ;;  %p92_p10 = scmp.lt.s32.totalorder %s86_s0, %s86_s0 }
  0x16   :  { %v34_v2 = vsub.s32 0, %v33_v1 }
  0x17   :  { %p93_p11 = por %p92_p10, %p91_p9 }
  0x18   :  { %v35_v8 = vrot.slane %v31_v5, %v34_v2 }
  0x19   :  { %p94_p12 = pnand %p93_p11, %p87_p8 }
  0x1a   :  { %vm36_vm1 = vcmp.eq.s32.totalorder %v35_v8, 1 }
  0x1b   :  { %v43_v9 = vsel %vm36_vm1, %v29_v6, %v60_v7 }
  0x1c   :  { %44 = vst [vmem:[#allocation5] sm:$0xff] %v43_v9 }
  0x1d   :  { %97 = shalt.err (!%p94_p12)
}
  0x1e   :  { %s98_s4 = scalar_lea.hbm %s168_s3, 128 }
  0x1f   :  { %p99_p13 = scmp.ne.s32.totalorder %s168_s3, %s98_s4  ;;  %p102_p0 = scmp.lt.u32.totalorder %s98_s4, %s168_s3 }
  0x21   :  { %p104_p1 = pnand %p102_p0, %p99_p13 }
  0x23   :  { %107 = shalt.err (!%p104_p1)
}
  0x24   :  { %54 = dma.vmem_to_hbm [thread:$0]  %s52_s27, 128, %s168_s3, [#allocation4]  }
  0x25   :  { %110 = dma.done.wait [#allocation4], 128  }
  0x26   :  { %111 = vsyncadd [#allocation4], 4294967168 }
  0x27   :  { %58 = vsyncpa [#allocation3], 1 }
  0x28   :  { %59 = vsyncpa [#allocation4], 1 }

</bundles_post_ra>
